<compile_context>
chip_gen: v5e
topology: v5e:2x2
jax: 0.10.0
libtpu: 0.0.40
codegen_flags: <defaults>
</compile_context>

<pallas_src>
import functools

import jax
import jax.numpy as jnp
from jax import lax
from jax.experimental import pallas as pl
from jax.experimental.pallas import tpu as pltpu


# Contract the trailing axis of both operands on the MXU:
# (tm, tk) . (tn, tk) -> (tm, tn)  — no explicit transpose / XLU traffic.
_DN_CONTRACT_LAST = (((1,), (1,)), ((), ()))


def _lora_kernel_acc_out(x_ref, w_ref, u_ref, a_ref, o_ref):
    """f32 output: accumulate directly into the resident output block."""
    k = pl.program_id(2)

    @pl.when(k == 0)
    def _init():
        o_ref[...] = jnp.zeros_like(o_ref)

    # Main GEMM partial product: x (tm, tk) . W (tn, tk) -> (tm, tn).
    o_ref[...] += lax.dot_general(
        x_ref[...], w_ref[...], _DN_CONTRACT_LAST,
        preferred_element_type=jnp.float32)

    @pl.when(k == pl.num_programs(2) - 1)
    def _finalize():
        # Rank-r correction: u (tm, r) . A (tn, r) -> (tm, tn), once per tile.
        o_ref[...] += lax.dot_general(
            u_ref[...], a_ref[...], _DN_CONTRACT_LAST,
            preferred_element_type=jnp.float32)


def _lora_kernel_scratch(x_ref, w_ref, u_ref, a_ref, o_ref, acc_ref):
    """Non-f32 output: f32 VMEM accumulator, cast once at the end."""
    k = pl.program_id(2)

    @pl.when(k == 0)
    def _init():
        acc_ref[...] = jnp.zeros_like(acc_ref)

    acc_ref[...] += lax.dot_general(
        x_ref[...], w_ref[...], _DN_CONTRACT_LAST,
        preferred_element_type=jnp.float32)

    @pl.when(k == pl.num_programs(2) - 1)
    def _finalize():
        lora = lax.dot_general(
            u_ref[...], a_ref[...], _DN_CONTRACT_LAST,
            preferred_element_type=jnp.float32)
        o_ref[...] = (acc_ref[...] + lora).astype(o_ref.dtype)


def _round_up(v, m):
    return ((v + m - 1) // m) * m


def _pick_tile(dim, target, align):
    """Largest multiple of `align` that divides `dim` and is <= target."""
    best = align
    t = align
    limit = min(dim, max(target, align))
    while t <= limit:
        if dim % t == 0:
            best = t
        t += align
    return best


def _maybe_pad2d(a, rows, cols):
    pr, pc = rows - a.shape[0], cols - a.shape[1]
    if pr == 0 and pc == 0:
        return a
    return jnp.pad(a, ((0, pr), (0, pc)))


@functools.partial(jax.jit, static_argnames=("tm", "tn", "tk", "compute_dtype"))
def lora_forward(x, W, A, B, *, tm=512, tn=1024, tk=512,
                 compute_dtype=jnp.bfloat16):
    """LoRA linear: y = x @ (W + A @ B)^T.

    x: (..., K); W: (N, K); A: (N, r); B: (r, K) -> (..., N).
    Defaults (tm=512, tn=1024, tk=512, bf16 operands) target v6e/v7x; on v5e
    tn=512 is a good choice.  Accumulation is always f32.
    """
    orig_shape = x.shape
    K = orig_shape[-1]
    x2d = x.reshape(-1, K)
    M = x2d.shape[0]
    N, r = A.shape
    out_dtype = x.dtype

    cdt = jnp.dtype(compute_dtype)
    m_align = 16 if cdt.itemsize == 2 else (32 if cdt.itemsize == 1 else 8)

    # Cast operands once in the wrapper (MXU runs at full rate on bf16; HBM
    # traffic for x/W halves).  Accumulation stays f32 inside the kernel.
    x_c = x2d.astype(compute_dtype)
    W_c = W.astype(compute_dtype)
    A_c = A.astype(compute_dtype)
    B_c = B.astype(compute_dtype)

    # LoRA intermediate u = x @ B^T (M x r): trivial FLOPs, computed once by
    # XLA outside the kernel so the k-loop has a single MXU matmul per step.
    u = jnp.dot(x_c, B_c.T,
                preferred_element_type=jnp.float32).astype(compute_dtype)

    # Minimal alignment padding (skipped when already aligned); tiles are then
    # chosen to divide the padded dims exactly, so W is never re-materialized
    # beyond the 128/sublane alignment slop.
    Mp = _round_up(M, m_align)
    Np = _round_up(N, 128)
    Kp = _round_up(K, 128)
    tm = _pick_tile(Mp, tm, m_align)
    tn = _pick_tile(Np, tn, 128)
    tk = _pick_tile(Kp, tk, 128)

    x_p = _maybe_pad2d(x_c, Mp, Kp)
    W_p = _maybe_pad2d(W_c, Np, Kp)
    A_p = _maybe_pad2d(A_c, Np, r)
    u_p = _maybe_pad2d(u, Mp, r)

    grid = (Mp // tm, Np // tn, Kp // tk)          # reduction (K) axis last

    acc_in_out = (out_dtype == jnp.float32)
    kernel = _lora_kernel_acc_out if acc_in_out else _lora_kernel_scratch
    scratch_shapes = [] if acc_in_out else [pltpu.VMEM((tm, tn), jnp.float32)]

    # VMEM budget from the actual double-buffered footprint (+25% headroom),
    # never below the 32 MiB default; stays well under v7x's 64 MiB/TC.
    out_itemsize = jnp.dtype(out_dtype).itemsize
    footprint = (2 * (tm * tk + tn * tk + tm * r + tn * r) * cdt.itemsize
                 + 2 * tm * tn * out_itemsize)
    if not acc_in_out:
        footprint += tm * tn * 4
    vmem_limit = max(32 * 1024 * 1024, int(footprint * 1.25))

    flops = 2 * M * N * K + 2 * M * N * r
    bytes_accessed = (x_p.size * x_p.dtype.itemsize
                      + W_p.size * W_p.dtype.itemsize
                      + u_p.size * u_p.dtype.itemsize
                      + A_p.size * A_p.dtype.itemsize
                      + Mp * Np * out_itemsize)

    out = pl.pallas_call(
        kernel,
        out_shape=jax.ShapeDtypeStruct((Mp, Np), out_dtype),
        grid=grid,
        in_specs=[
            pl.BlockSpec((tm, tk), lambda i, j, k: (i, k)),   # x tile
            pl.BlockSpec((tn, tk), lambda i, j, k: (j, k)),   # W tile
            pl.BlockSpec((tm, r), lambda i, j, k: (i, 0)),    # u tile (full r)
            pl.BlockSpec((tn, r), lambda i, j, k: (j, 0)),    # A tile (full r)
        ],
        out_specs=pl.BlockSpec((tm, tn), lambda i, j, k: (i, j)),
        scratch_shapes=scratch_shapes,
        compiler_params=pltpu.CompilerParams(
            # i/j shard across TensorCores (v7x megacore); K is the reduction.
            dimension_semantics=("parallel", "parallel", "arbitrary"),
            vmem_limit_bytes=vmem_limit,
        ),
        cost_estimate=pl.CostEstimate(
            flops=flops, transcendentals=0, bytes_accessed=bytes_accessed),
    )(x_p, W_p, u_p, A_p)

    return out[:M, :N].reshape(orig_shape[:-1] + (N,))


if __name__ == "__main__":
    # Shapes matching the module: layer = nn.Linear(in_features, out_features), r=4.
    batch, seq = 2, 8
    in_features, out_features, r = 32, 32, 4

    key = jax.random.PRNGKey(0)
    kx, kw, ka, kb = jax.random.split(key, 4)

    x = jax.random.normal(kx, (batch, seq, in_features), dtype=jnp.float32)
    W = jax.random.normal(kw, (out_features, in_features), dtype=jnp.float32)
    A = jax.random.normal(ka, (out_features, r), dtype=jnp.float32)
    B = jax.random.normal(kb, (r, in_features), dtype=jnp.float32)

    # Reference: the original (materialized) formulation in plain JAX.
    y_ref = jnp.einsum("bsk,nk->bsn", x, W + A @ B)
    scale = jnp.max(jnp.abs(y_ref))

    # Exact path (f32 operands) — tight tolerance.
    y_f32 = lora_forward(x, W, A, B, compute_dtype=jnp.float32)
    jax.block_until_ready(y_f32)
    assert y_f32.shape == (batch, seq, out_features)
    assert jnp.allclose(y_f32, y_ref, atol=1e-4, rtol=1e-4)

    # Default mixed-precision path (bf16 operands, f32 accumulation).
    y_bf = lora_forward(x, W, A, B)
    jax.block_until_ready(y_bf)
    assert jnp.max(jnp.abs(y_bf.astype(jnp.float32) - y_ref)) <= 0.04 * scale + 0.1

    # bf16 inputs/output exercise the f32-scratch accumulator path.
    y_b16 = lora_forward(x.astype(jnp.bfloat16), W.astype(jnp.bfloat16),
                         A.astype(jnp.bfloat16), B.astype(jnp.bfloat16))
    jax.block_until_ready(y_b16)
    assert y_b16.dtype == jnp.bfloat16
    assert jnp.max(jnp.abs(y_b16.astype(jnp.float32) - y_ref)) <= 0.05 * scale + 0.1

    print("KERNEL_OK")
</pallas_src>

<mosaic_0001>
module attributes {stable_mosaic.version = 11 : i64} {
  func.func @_lora_kernel_acc_out(%arg0: i32, %arg1: i32, %arg2: i32, %arg3: memref<16x128xf32, #tpu.memory_space<vmem>>, %arg4: memref<128x128xf32, #tpu.memory_space<vmem>>, %arg5: memref<16x4xf32, #tpu.memory_space<vmem>>, %arg6: memref<128x4xf32, #tpu.memory_space<vmem>>, %arg7: memref<16x128xf32, #tpu.memory_space<vmem>>) attributes {dimension_semantics = [#tpu.dimension_semantics<parallel>, #tpu.dimension_semantics<parallel>, #tpu.dimension_semantics<arbitrary>], iteration_bounds = array<i64: 1, 1, 1>, scalar_prefetch = 0 : i64, scratch_operands = 0 : i64, tpu.core_type = #tpu.core_type<tc>, window_params = [{transform_indices = @transform_0, window_bounds = array<i64: 16, 128>}, {transform_indices = @transform_1, window_bounds = array<i64: 128, 128>}, {transform_indices = @transform_2, window_bounds = array<i64: 16, 4>}, {transform_indices = @transform_3, window_bounds = array<i64: 128, 4>}, {transform_indices = @transform_4, window_bounds = array<i64: 16, 128>}]} {
    %c0_i32 = arith.constant 0 : i32
    %0 = arith.cmpi eq, %arg2, %c0_i32 : i32
    %1 = arith.extui %0 : i1 to i32
    %c0_i32_0 = arith.constant 0 : i32
    %2 = arith.cmpi ne, %1, %c0_i32_0 : i32
    scf.if %2 {
      %cst_10 = arith.constant 0.000000e+00 : f32
      %12 = vector.broadcast %cst_10 : f32 to vector<16x128xf32>
      %c0_11 = arith.constant 0 : index
      %c0_12 = arith.constant 0 : index
      %13 = vector.load %arg7[%c0_11, %c0_12] : memref<16x128xf32, #tpu.memory_space<vmem>>, vector<16x128xf32>
      tpu.vector_store %arg7[%c0_11, %c0_12], %12 {strides = array<i32>} : memref<16x128xf32, #tpu.memory_space<vmem>>, vector<16x128xf32>,
    } else {
    }
    %c0 = arith.constant 0 : index
    %c0_1 = arith.constant 0 : index
    %3 = vector.load %arg7[%c0, %c0_1] : memref<16x128xf32, #tpu.memory_space<vmem>>, vector<16x128xf32>
    %c0_2 = arith.constant 0 : index
    %c0_3 = arith.constant 0 : index
    %4 = vector.load %arg3[%c0_2, %c0_3] : memref<16x128xf32, #tpu.memory_space<vmem>>, vector<16x128xf32>
    %c0_4 = arith.constant 0 : index
    %c0_5 = arith.constant 0 : index
    %5 = vector.load %arg4[%c0_4, %c0_5] : memref<128x128xf32, #tpu.memory_space<vmem>>, vector<128x128xf32>
    %cst = arith.constant dense<0.000000e+00> : vector<16x128xf32>
    %6 = tpu.matmul %4, %5, %cst {dimension_numbers = #tpu.dot_dimension_numbers<[1], [1], [0], [0], [0, 0, 1, 0], [], []>} : vector<16x128xf32>, vector<128x128xf32>, vector<16x128xf32> -> vector<16x128xf32>
    %7 = arith.addf %3, %6 : vector<16x128xf32>
    %c0_6 = arith.constant 0 : index
    %c0_7 = arith.constant 0 : index
    %8 = vector.load %arg7[%c0_6, %c0_7] : memref<16x128xf32, #tpu.memory_space<vmem>>, vector<16x128xf32>
    tpu.vector_store %arg7[%c0_6, %c0_7], %7 {strides = array<i32>} : memref<16x128xf32, #tpu.memory_space<vmem>>, vector<16x128xf32>,
    %c0_i32_8 = arith.constant 0 : i32
    %9 = arith.cmpi eq, %arg2, %c0_i32_8 : i32
    %10 = arith.extui %9 : i1 to i32
    %c0_i32_9 = arith.constant 0 : i32
    %11 = arith.cmpi ne, %10, %c0_i32_9 : i32
    scf.if %11 {
      %c0_10 = arith.constant 0 : index
      %c0_11 = arith.constant 0 : index
      %12 = vector.load %arg7[%c0_10, %c0_11] : memref<16x128xf32, #tpu.memory_space<vmem>>, vector<16x128xf32>
      %c0_12 = arith.constant 0 : index
      %c0_13 = arith.constant 0 : index
      %13 = vector.load %arg5[%c0_12, %c0_13] : memref<16x4xf32, #tpu.memory_space<vmem>>, vector<16x4xf32>
      %c0_14 = arith.constant 0 : index
      %c0_15 = arith.constant 0 : index
      %14 = vector.load %arg6[%c0_14, %c0_15] : memref<128x4xf32, #tpu.memory_space<vmem>>, vector<128x4xf32>
      %cst_16 = arith.constant dense<0.000000e+00> : vector<16x128xf32>
      %15 = tpu.matmul %13, %14, %cst_16 {dimension_numbers = #tpu.dot_dimension_numbers<[1], [1], [0], [0], [0, 0, 1, 0], [], []>} : vector<16x4xf32>, vector<128x4xf32>, vector<16x128xf32> -> vector<16x128xf32>
      %16 = arith.addf %12, %15 : vector<16x128xf32>
      %c0_17 = arith.constant 0 : index
      %c0_18 = arith.constant 0 : index
      %17 = vector.load %arg7[%c0_17, %c0_18] : memref<16x128xf32, #tpu.memory_space<vmem>>, vector<16x128xf32>
      tpu.vector_store %arg7[%c0_17, %c0_18], %16 {strides = array<i32>} : memref<16x128xf32, #tpu.memory_space<vmem>>, vector<16x128xf32>,
    } else {
    }
    return
  }
  func.func @transform_0(%arg0: i32, %arg1: i32, %arg2: i32) -> (i32, i32) {
    %c0_i32 = arith.constant 0 : i32
    return %arg0, %arg2 : i32, i32
  }
  func.func @transform_1(%arg0: i32, %arg1: i32, %arg2: i32) -> (i32, i32) {
    %c0_i32 = arith.constant 0 : i32
    return %arg1, %arg2 : i32, i32
  }
  func.func @transform_2(%arg0: i32, %arg1: i32, %arg2: i32) -> (i32, i32) {
    %c0_i32 = arith.constant 0 : i32
    %c0_i32_0 = arith.constant 0 : i32
    return %arg0, %c0_i32 : i32, i32
  }
  func.func @transform_3(%arg0: i32, %arg1: i32, %arg2: i32) -> (i32, i32) {
    %c0_i32 = arith.constant 0 : i32
    %c0_i32_0 = arith.constant 0 : i32
    return %arg1, %c0_i32 : i32, i32
  }
  func.func @transform_4(%arg0: i32, %arg1: i32, %arg2: i32) -> (i32, i32) {
    %c0_i32 = arith.constant 0 : i32
    return %arg0, %arg1 : i32, i32
  }
}

</mosaic_0001>

<bundles_post_ra>
// kernel: lora_forward.1
= control target key start
LH: loop header
LB: loop body
LE: loop exit
PB: predicated region body
PF: predicated region fallthrough
CT: control target
= control target key end

     0   :  { %vm93_vm0 = vcmask 31744   ;;  %s403_s1 = inlined_call_operand.vmem [shape: f32[128,128], index: 1, kind: input, shape index: {}]   ;;  %s404_s3 = inlined_call_operand.vmem [shape: f32[128,4], index: 3, kind: input, shape index: {}]   ;;  %s405_s0 = inlined_call_operand.vmem [shape: f32[16,128], index: 0, kind: input, shape index: {}]   ;;  %s406_s2 = inlined_call_operand.vmem [shape: f32[16,4], index: 2, kind: input, shape index: {}]   ;;  %s407_s4 = inlined_call_operand.vmem [shape: f32[16,128], index: 4, kind: output, shape index: {}]  }
   0x1   :  { %v42_v0 = vld [vmem:[%s403_s1 + $0x78] sm:$0xff]  ;;  %v41_v2 = vld [vmem:[%s403_s1 + $0x70] sm:$0xff]  ;;  %v40_v4 = vld [vmem:[%s403_s1 + $0x68] sm:$0xff] }
   0x2   :  { %197 = vmatpush.xpose.msra.mxu2 %v42_v0  ;;  %43 = vmatpush.xpose.msra.mxu0 %v42_v0  ;;  %v92_v1 = vld [vmem:[%s404_s3 + $0x78] sm:$0xff]  ;;  %v91_v3 = vld [vmem:[%s404_s3 + $0x70] sm:$0xff]  ;;  %v90_v5 = vld [vmem:[%s404_s3 + $0x68] sm:$0xff] }
   0x3   :  { %213 = vmatpush.xpose.msk.msra.mxu3 %vm93_vm0, %v92_v1  ;;  %179 = vmatpush.xpose.msk.msra.mxu1 %vm93_vm0, %v92_v1  ;;  %v39_v6 = vld [vmem:[%s403_s1 + $0x60] sm:$0xff]  ;;  %v38_v8 = vld [vmem:[%s403_s1 + $0x58] sm:$0xff]  ;;  %v37_v10 = vld [vmem:[%s403_s1 + $0x50] sm:$0xff] }
   0x4   :  { %v89_v7 = vld [vmem:[%s404_s3 + $0x60] sm:$0xff]  ;;  %v88_v9 = vld [vmem:[%s404_s3 + $0x58] sm:$0xff]  ;;  %v87_v11 = vld [vmem:[%s404_s3 + $0x50] sm:$0xff] }
   0x5   :  { %v36_v12 = vld [vmem:[%s403_s1 + $0x48] sm:$0xff]  ;;  %v35_v14 = vld [vmem:[%s403_s1 + $0x40] sm:$0xff]  ;;  %v34_v16 = vld [vmem:[%s403_s1 + $0x38] sm:$0xff] }
   0x6   :  { %198 = vmatpush.xpose.msra.mxu2 %v41_v2  ;;  %44 = vmatpush.xpose.msra.mxu0 %v41_v2  ;;  %v86_v13 = vld [vmem:[%s404_s3 + $0x48] sm:$0xff]  ;;  %v85_v15 = vld [vmem:[%s404_s3 + $0x40] sm:$0xff]  ;;  %v84_v17 = vld [vmem:[%s404_s3 + $0x38] sm:$0xff] }
   0x7   :  { %214 = vmatpush.xpose.msk.msra.mxu3 %vm93_vm0, %v91_v3  ;;  %180 = vmatpush.xpose.msk.msra.mxu1 %vm93_vm0, %v91_v3  ;;  %v33_v18 = vld [vmem:[%s403_s1 + $0x30] sm:$0xff]  ;;  %v32_v20 = vld [vmem:[%s403_s1 + $0x28] sm:$0xff]  ;;  %v31_v22 = vld [vmem:[%s403_s1 + $0x20] sm:$0xff] }
   0x8   :  { %v83_v19 = vld [vmem:[%s404_s3 + $0x30] sm:$0xff]  ;;  %v82_v21 = vld [vmem:[%s404_s3 + $0x28] sm:$0xff]  ;;  %v81_v23 = vld [vmem:[%s404_s3 + $0x20] sm:$0xff] }
   0x9   :  { %v30_v24 = vld [vmem:[%s403_s1 + $0x18] sm:$0xff]  ;;  %v29_v26 = vld [vmem:[%s403_s1 + $0x10] sm:$0xff]  ;;  %v28_v28 = vld [vmem:[%s403_s1 + $0x8] sm:$0xff] }
   0xa   :  { %199 = vmatpush.xpose.msra.mxu2 %v40_v4  ;;  %45 = vmatpush.xpose.msra.mxu0 %v40_v4  ;;  %v80_v25 = vld [vmem:[%s404_s3 + $0x18] sm:$0xff]  ;;  %v79_v27 = vld [vmem:[%s404_s3 + $0x10] sm:$0xff]  ;;  %v78_v29 = vld [vmem:[%s404_s3 + $0x8] sm:$0xff] }
   0xb   :  { %215 = vmatpush.xpose.msk.msra.mxu3 %vm93_vm0, %v90_v5  ;;  %181 = vmatpush.xpose.msk.msra.mxu1 %vm93_vm0, %v90_v5  ;;  %v27_v30 = vld [vmem:[%s403_s1] sm:$0xff]  ;;  %v26_v32 = vld [vmem:[%s405_s0 + $0x8] sm:$0xff] }
   0xc   :  { %v77_v31 = vld [vmem:[%s404_s3] sm:$0xff]  ;;  %v76_v34 = vld [vmem:[%s406_s2 + $0x8] sm:$0xff] }
   0xd   :  { %v25_v33 = vld [vmem:[%s405_s0] sm:$0xff] }
   0xe   :  { %200 = vmatpush.xpose.msra.mxu2 %v39_v6  ;;  %46 = vmatpush.xpose.msra.mxu0 %v39_v6  ;;  %v75_v35 = vld [vmem:[%s406_s2] sm:$0xff] }
   0xf   :  { %216 = vmatpush.xpose.msk.msra.mxu3 %vm93_vm0, %v89_v7  ;;  %182 = vmatpush.xpose.msk.msra.mxu1 %vm93_vm0, %v89_v7 }
  0x12   :  { %201 = vmatpush.xpose.msra.mxu2 %v38_v8  ;;  %47 = vmatpush.xpose.msra.mxu0 %v38_v8 }
  0x13   :  { %217 = vmatpush.xpose.msk.msra.mxu3 %vm93_vm0, %v88_v9  ;;  %183 = vmatpush.xpose.msk.msra.mxu1 %vm93_vm0, %v88_v9 }
  0x16   :  { %202 = vmatpush.xpose.msra.mxu2 %v37_v10  ;;  %48 = vmatpush.xpose.msra.mxu0 %v37_v10 }
  0x17   :  { %218 = vmatpush.xpose.msk.msra.mxu3 %vm93_vm0, %v87_v11  ;;  %184 = vmatpush.xpose.msk.msra.mxu1 %vm93_vm0, %v87_v11 }
  0x1a   :  { %203 = vmatpush.xpose.msra.mxu2 %v36_v12  ;;  %49 = vmatpush.xpose.msra.mxu0 %v36_v12 }
  0x1b   :  { %219 = vmatpush.xpose.msk.msra.mxu3 %vm93_vm0, %v86_v13  ;;  %185 = vmatpush.xpose.msk.msra.mxu1 %vm93_vm0, %v86_v13 }
  0x1e   :  { %204 = vmatpush.xpose.msra.mxu2 %v35_v14  ;;  %50 = vmatpush.xpose.msra.mxu0 %v35_v14 }
  0x1f   :  { %220 = vmatpush.xpose.msk.msra.mxu3 %vm93_vm0, %v85_v15  ;;  %186 = vmatpush.xpose.msk.msra.mxu1 %vm93_vm0, %v85_v15 }
  0x22   :  { %205 = vmatpush.xpose.msra.mxu2 %v34_v16  ;;  %51 = vmatpush.xpose.msra.mxu0 %v34_v16 }
  0x23   :  { %221 = vmatpush.xpose.msk.msra.mxu3 %vm93_vm0, %v84_v17  ;;  %187 = vmatpush.xpose.msk.msra.mxu1 %vm93_vm0, %v84_v17 }
  0x26   :  { %206 = vmatpush.xpose.msra.mxu2 %v33_v18  ;;  %52 = vmatpush.xpose.msra.mxu0 %v33_v18 }
  0x27   :  { %222 = vmatpush.xpose.msk.msra.mxu3 %vm93_vm0, %v83_v19  ;;  %188 = vmatpush.xpose.msk.msra.mxu1 %vm93_vm0, %v83_v19 }
  0x2a   :  { %207 = vmatpush.xpose.msra.mxu2 %v32_v20  ;;  %53 = vmatpush.xpose.msra.mxu0 %v32_v20 }
  0x2b   :  { %223 = vmatpush.xpose.msk.msra.mxu3 %vm93_vm0, %v82_v21  ;;  %189 = vmatpush.xpose.msk.msra.mxu1 %vm93_vm0, %v82_v21 }
  0x2e   :  { %208 = vmatpush.xpose.msra.mxu2 %v31_v22  ;;  %54 = vmatpush.xpose.msra.mxu0 %v31_v22 }
  0x2f   :  { %224 = vmatpush.xpose.msk.msra.mxu3 %vm93_vm0, %v81_v23  ;;  %190 = vmatpush.xpose.msk.msra.mxu1 %vm93_vm0, %v81_v23 }
  0x32   :  { %209 = vmatpush.xpose.msra.mxu2 %v30_v24  ;;  %55 = vmatpush.xpose.msra.mxu0 %v30_v24 }
  0x33   :  { %225 = vmatpush.xpose.msk.msra.mxu3 %vm93_vm0, %v80_v25  ;;  %191 = vmatpush.xpose.msk.msra.mxu1 %vm93_vm0, %v80_v25 }
  0x36   :  { %210 = vmatpush.xpose.msra.mxu2 %v29_v26  ;;  %56 = vmatpush.xpose.msra.mxu0 %v29_v26 }
  0x37   :  { %226 = vmatpush.xpose.msk.msra.mxu3 %vm93_vm0, %v79_v27  ;;  %192 = vmatpush.xpose.msk.msra.mxu1 %vm93_vm0, %v79_v27 }
  0x3a   :  { %211 = vmatpush.xpose.msra.mxu2 %v28_v28  ;;  %57 = vmatpush.xpose.msra.mxu0 %v28_v28 }
  0x3b   :  { %227 = vmatpush.xpose.msk.msra.mxu3 %vm93_vm0, %v78_v29  ;;  %193 = vmatpush.xpose.msk.msra.mxu1 %vm93_vm0, %v78_v29 }
  0x3e   :  { %212 = vmatpush.xpose.msra.mxu2 %v27_v30  ;;  %58 = vmatpush.xpose.msra.mxu0 %v27_v30 }
  0x3f   :  { %228 = vmatpush.xpose.msk.msra.mxu3 %vm93_vm0, %v77_v31  ;;  %194 = vmatpush.xpose.msk.msra.mxu1 %vm93_vm0, %v77_v31 }
  0x41   :  { %62 = vmatmul.f32.vlgmr.msra.gmra.mxu2 %v26_v32  ;;  %59 = vmatmul.f32.vlgmr.msra.gmra.mxu0 %v25_v33 }
  0x42   :  { %196 = vmatmul.msk.f32.vlgmr.msra.gmra.mxu3 %vm93_vm0, %v76_v34  ;;  %195 = vmatmul.msk.f32.vlgmr.msra.gmra.mxu1 %vm93_vm0, %v75_v35 }
  0xbe   :  { %v60_v36 = vpop.f32.mrf.mxu0 }
  0xbf   :  { %v165_v37 = vpop.f32.mrf.mxu1 }
  0xc0   :  { %v171_v38 = vadd.f32 %v165_v37, %v60_v36 }
  0xc2   :  { %173 = vst [vmem:[%s407_s4] sm:$0xff] %v171_v38 }
  0xc4   :  { %v63_v39 = vpop.f32.mrf.mxu2 }
  0xc5   :  { %v168_v40 = vpop.f32.mrf.mxu3 }
  0xc6   :  { %v172_v41 = vadd.f32 %v168_v40, %v63_v39 }
  0xc8   :  { %174 = vst [vmem:[%s407_s4 + $0x8] sm:$0xff] %v172_v41 }

</bundles_post_ra>
